<compile_context>
chip_gen: v7x
topology: tpu7x:2x2x1
jax: 0.10.0
libtpu: 0.0.40
codegen_flags: <defaults>
</compile_context>

<pallas_src>
import functools

import jax
import jax.numpy as jnp
from jax.experimental import pallas as pl
from jax.experimental.pallas import tpu as pltpu


def _round_up(x, m):
    return ((x + m - 1) // m) * m


def rnn_cell_kernel(xh_ref, w_ref, b_ref, out_ref):
    # One MXU pass over the fused [x | hy] @ [Wx^T ; W_circ] weight, then a
    # lane-dense store of tanh(acc + bias).
    acc = jnp.dot(xh_ref[...], w_ref[...], preferred_element_type=jnp.float32)
    out_ref[...] = jnp.tanh(acc + b_ref[...])


def rnn_cell_forward(x, hy, wx_weight, wx_bias, wy_weight, wy_bias,
                     *, n_hid, n_ch, ksize):
    """Pallas wrapper. x: (B, n_inp), hy: (B, n_ch*n_hid). Returns (B, n_ch*n_hid)."""
    batch, n_inp = x.shape
    n_out = n_ch * n_hid
    pad = ksize // 2

    # ---- Parameter prep (plain JAX, done once per set of weights) ----------
    # Circular conv as a block-circulant matmul:
    #   conv[b, co, t] = sum_{ci,k} wy[co,ci,k] * hy[b, ci, (t+k-pad) % n_hid]
    # => W_circ[(ci,s), (co,t)] = sum_k wy[co,ci,k] * [s == (t+k-pad) % n_hid]
    t = jnp.arange(n_hid)
    src = (t[None, :] + jnp.arange(ksize)[:, None] - pad) % n_hid   # (ksize, n_hid)
    shifts = jax.nn.one_hot(src, n_hid, axis=1, dtype=jnp.float32)  # (ksize, s, t)
    w_circ = jnp.einsum('ock,kst->csot', wy_weight, shifts).reshape(n_out, n_out)

    w_full = jnp.concatenate([wx_weight.T, w_circ], axis=0)         # (n_inp+n_out, n_out)
    b_full = (wx_bias + jnp.repeat(wy_bias, n_hid)).reshape(1, n_out)
    xh = jnp.concatenate([x, hy], axis=1)                           # (B, n_inp+n_out)

    # ---- Pad to TPU-friendly tiles ------------------------------------------
    K = n_inp + n_out
    Kp = _round_up(K, 128)
    Np = _round_up(n_out, 128)
    TM = 128 if batch >= 128 else _round_up(batch, 8)
    Mp = _round_up(batch, TM)

    xh_p = jnp.pad(xh, ((0, Mp - batch), (0, Kp - K)))
    w_p = jnp.pad(w_full, ((0, Kp - K), (0, Np - n_out)))
    b_p = jnp.pad(b_full, ((0, 0), (0, Np - n_out)))

    out_p = pl.pallas_call(
        rnn_cell_kernel,
        out_shape=jax.ShapeDtypeStruct((Mp, Np), jnp.float32),
        grid=(Mp // TM,),
        in_specs=[
            pl.BlockSpec((TM, Kp), lambda i: (i, 0)),   # [x | hy] batch tile
            pl.BlockSpec((Kp, Np), lambda i: (0, 0)),   # fused weight (resident)
            pl.BlockSpec((1, Np), lambda i: (0, 0)),    # fused bias (resident)
        ],
        out_specs=pl.BlockSpec((TM, Np), lambda i: (i, 0)),
        compiler_params=pltpu.CompilerParams(
            dimension_semantics=("parallel",)),
    )(xh_p, w_p, b_p)

    return out_p[:batch, :n_out]


def rnn_cell_reference(x, hy, wx_weight, wx_bias, wy_weight, wy_bias,
                       *, n_hid, n_ch, ksize):
    """Pure-JAX reference mirroring the PyTorch forward."""
    batch = x.shape[0]
    pad = ksize // 2
    lin = x @ wx_weight.T + wx_bias                       # (B, n_ch*n_hid)
    h = hy.reshape(batch, n_ch, n_hid)                    # (B, n_ch, n_hid)
    padded = jnp.concatenate([h[..., -pad:], h, h[..., :pad]], axis=-1)
    windows = jnp.stack([padded[..., k:k + n_hid] for k in range(ksize)], axis=-1)
    # conv[b, co, t] = sum_{ci,k} wy[co, ci, k] * h_padded[b, ci, t + k] + by[co]
    conv = jnp.einsum('bctk,ock->bot', windows, wy_weight) + wy_bias[None, :, None]
    return jnp.tanh(lin + conv.reshape(batch, n_ch * n_hid))


if __name__ == "__main__":
    # Small shapes consistent with the module.
    B, N_INP, N_HID, N_CH, KSIZE = 4, 16, 32, 2, 3

    key = jax.random.PRNGKey(0)
    k_x, k_h, k_wx, k_bx, k_by = jax.random.split(key, 5)

    # Deterministic parameter init mirroring __init__ (act='tanh', init='eye',
    # solo_init='no'):
    #   Wx.weight ~ Normal(0, 0.001);  Wx.bias ~ U(-1/sqrt(n_inp), 1/sqrt(n_inp))
    #   Wy.weight = dirac (identity conv);  Wy.bias ~ U(-1/sqrt(n_ch*ksize), ...)
    wx_weight = 0.001 * jax.random.normal(k_wx, (N_HID * N_CH, N_INP), jnp.float32)
    bound_x = 1.0 / jnp.sqrt(jnp.float32(N_INP))
    wx_bias = jax.random.uniform(k_bx, (N_HID * N_CH,), jnp.float32,
                                 minval=-bound_x, maxval=bound_x)
    wy_weight = jnp.zeros((N_CH, N_CH, KSIZE), jnp.float32)
    wy_weight = wy_weight.at[jnp.arange(N_CH), jnp.arange(N_CH), KSIZE // 2].set(1.0)
    bound_y = 1.0 / jnp.sqrt(jnp.float32(N_CH * KSIZE))
    wy_bias = jax.random.uniform(k_by, (N_CH,), jnp.float32,
                                 minval=-bound_y, maxval=bound_y)

    x = jax.random.normal(k_x, (B, N_INP), jnp.float32)
    hy = jax.random.normal(k_h, (B, N_CH * N_HID), jnp.float32)

    fwd = jax.jit(functools.partial(rnn_cell_forward,
                                    n_hid=N_HID, n_ch=N_CH, ksize=KSIZE))
    out = fwd(x, hy, wx_weight, wx_bias, wy_weight, wy_bias)
    out = jax.block_until_ready(out)

    ref = rnn_cell_reference(x, hy, wx_weight, wx_bias, wy_weight, wy_bias,
                             n_hid=N_HID, n_ch=N_CH, ksize=KSIZE)
    assert out.shape == (B, N_CH * N_HID)
    assert jnp.allclose(out, ref, atol=1e-5, rtol=1e-5), "mismatch vs reference"
    print("KERNEL_OK")
</pallas_src>

<mosaic_0001>
module attributes {stable_mosaic.version = 11 : i64} {
  func.func @rnn_cell_kernel(%arg0: i32, %arg1: memref<8x128xf32, #tpu.memory_space<vmem>>, %arg2: memref<128x128xf32, #tpu.memory_space<vmem>>, %arg3: memref<1x128xf32, #tpu.memory_space<vmem>>, %arg4: memref<8x128xf32, #tpu.memory_space<vmem>>) attributes {dimension_semantics = [#tpu.dimension_semantics<parallel>], iteration_bounds = array<i64: 1>, scalar_prefetch = 0 : i64, scratch_operands = 0 : i64, tpu.core_type = #tpu.core_type<tc>, window_params = [{transform_indices = @transform_0, window_bounds = array<i64: 8, 128>}, {pipeline_mode = #tpu.pipeline_mode<synchronous>, transform_indices = @transform_1, window_bounds = array<i64: 128, 128>}, {pipeline_mode = #tpu.pipeline_mode<synchronous>, transform_indices = @transform_2, window_bounds = array<i64: 1, 128>}, {transform_indices = @transform_3, window_bounds = array<i64: 8, 128>}]} {
    %c0 = arith.constant 0 : index
    %c0_0 = arith.constant 0 : index
    %0 = vector.load %arg1[%c0, %c0_0] : memref<8x128xf32, #tpu.memory_space<vmem>>, vector<8x128xf32>
    %c0_1 = arith.constant 0 : index
    %c0_2 = arith.constant 0 : index
    %1 = vector.load %arg2[%c0_1, %c0_2] : memref<128x128xf32, #tpu.memory_space<vmem>>, vector<128x128xf32>
    %cst = arith.constant dense<0.000000e+00> : vector<8x128xf32>
    %2 = tpu.matmul %0, %1, %cst {dimension_numbers = #tpu.dot_dimension_numbers<[1], [0], [0], [1], [0, 0, 1, 1], [], []>} : vector<8x128xf32>, vector<128x128xf32>, vector<8x128xf32> -> vector<8x128xf32>
    %c0_3 = arith.constant 0 : index
    %c0_4 = arith.constant 0 : index
    %3 = vector.load %arg3[%c0_3, %c0_4] : memref<1x128xf32, #tpu.memory_space<vmem>>, vector<1x128xf32>
    %4 = vector.broadcast %3 : vector<1x128xf32> to vector<8x128xf32>
    %5 = arith.addf %2, %4 : vector<8x128xf32>
    %6 = math.tanh %5 : vector<8x128xf32>
    %c0_5 = arith.constant 0 : index
    %c0_6 = arith.constant 0 : index
    %7 = vector.load %arg4[%c0_5, %c0_6] : memref<8x128xf32, #tpu.memory_space<vmem>>, vector<8x128xf32>
    tpu.vector_store %arg4[%c0_5, %c0_6], %6 {strides = array<i32>} : memref<8x128xf32, #tpu.memory_space<vmem>>, vector<8x128xf32>,
    return
  }
  func.func @transform_0(%arg0: i32) -> (i32, i32) {
    %c0_i32 = arith.constant 0 : i32
    %c0_i32_0 = arith.constant 0 : i32
    return %arg0, %c0_i32 : i32, i32
  }
  func.func @transform_1(%arg0: i32) -> (i32, i32) {
    %c0_i32 = arith.constant 0 : i32
    %c0_i32_0 = arith.constant 0 : i32
    %c0_i32_1 = arith.constant 0 : i32
    return %c0_i32, %c0_i32_0 : i32, i32
  }
  func.func @transform_2(%arg0: i32) -> (i32, i32) {
    %c0_i32 = arith.constant 0 : i32
    %c0_i32_0 = arith.constant 0 : i32
    %c0_i32_1 = arith.constant 0 : i32
    return %c0_i32, %c0_i32_0 : i32, i32
  }
  func.func @transform_3(%arg0: i32) -> (i32, i32) {
    %c0_i32 = arith.constant 0 : i32
    %c0_i32_0 = arith.constant 0 : i32
    return %arg0, %c0_i32 : i32, i32
  }
}

</mosaic_0001>

<bundles_post_ra>
// kernel: rnn_cell_forward.1
= control target key start
LH: loop header
LB: loop body
LE: loop exit
PB: predicated region body
PF: predicated region fallthrough
CT: control target
= control target key end

     0   :  { %v196_v0 = vmov 0.0|0.0   ;;  %vm197_vm0 = vmmov 0   ;;  %v198_v4 = vmov 0.0   ;;  %s276_s1 = inlined_call_operand.vmem [shape: f32[128,128], index: 1, kind: input, shape index: {}]   ;;  %s277_s0 = inlined_call_operand.vmem [shape: f32[8,128], index: 0, kind: input, shape index: {}]   ;;  %s278_s2 = inlined_call_operand.vmem [shape: f32[1,128], index: 2, kind: input, shape index: {}]   ;;  %s279_s3 = inlined_call_operand.vmem [shape: f32[8,128], index: 3, kind: output, shape index: {}]  }
   0x1   :  { %167 = vmatprep.subr.bf16.mxu0 %v196_v0  ;;  %v15_v1 = vld [vmem:[%s276_s1] sm:$0xff]  ;;  %v16_v2 = vld [vmem:[%s276_s1 + $0x8] sm:$0xff]  ;;  %v17_v3 = vld [vmem:[%s276_s1 + $0x10] sm:$0xff]  ;;  %164 = vmatprep.mubr.msk.f32.mxu0 %vm197_vm0, %v198_v4 }
   0x2   :  { %v168_v5 = vpack.c.bf16 %v16_v2, %v15_v1  ;;  %v18_v6 = vld [vmem:[%s276_s1 + $0x18] sm:$0xff]  ;;  %v19_v8 = vld [vmem:[%s276_s1 + $0x20] sm:$0xff]  ;;  %v20_v9 = vld [vmem:[%s276_s1 + $0x28] sm:$0xff] }
   0x3   :  { %v171_v7 = vpack.c.bf16 %v18_v6, %v17_v3  ;;  %v174_v10 = vpack.c.bf16 %v20_v9, %v19_v8  ;;  %v21_v11 = vld [vmem:[%s276_s1 + $0x30] sm:$0xff]  ;;  %v22_v12 = vld [vmem:[%s276_s1 + $0x38] sm:$0xff]  ;;  %v23_v14 = vld [vmem:[%s276_s1 + $0x40] sm:$0xff] }
   0x4   :  { %169 = vmatpush3.bf16.msra.mxu0 %v168_v5  ;;  %v177_v13 = vpack.c.bf16 %v22_v12, %v21_v11  ;;  %v24_v15 = vld [vmem:[%s276_s1 + $0x48] sm:$0xff]  ;;  %v25_v17 = vld [vmem:[%s276_s1 + $0x50] sm:$0xff]  ;;  %v26_v18 = vld [vmem:[%s276_s1 + $0x58] sm:$0xff] }
   0x5   :  { %170 = vmatprep.subr.bf16.mxu0 %v196_v0  ;;  %v180_v16 = vpack.c.bf16 %v24_v15, %v23_v14  ;;  %v183_v19 = vpack.c.bf16 %v26_v18, %v25_v17  ;;  %v27_v20 = vld [vmem:[%s276_s1 + $0x60] sm:$0xff]  ;;  %v28_v21 = vld [vmem:[%s276_s1 + $0x68] sm:$0xff]  ;;  %v29_v23 = vld [vmem:[%s276_s1 + $0x70] sm:$0xff] }
   0x6   :  { %v186_v22 = vpack.c.bf16 %v28_v21, %v27_v20  ;;  %v30_v24 = vld [vmem:[%s276_s1 + $0x78] sm:$0xff]  ;;  %v14_v26 = vld [vmem:[%s277_s0] sm:$0xff] }
   0x7   :  { %v189_v25 = vpack.c.bf16 %v30_v24, %v29_v23  ;;  %v114_v27 = vld [vmem:[%s278_s2] ss:$0 sm:$0xff] }
   0x8   :  { %172 = vmatpush3.bf16.msra.mxu0 %v171_v7 }
   0x9   :  { %173 = vmatprep.subr.bf16.mxu0 %v196_v0 }
   0xc   :  { %175 = vmatpush3.bf16.msra.mxu0 %v174_v10 }
   0xd   :  { %176 = vmatprep.subr.bf16.mxu0 %v196_v0 }
  0x10   :  { %178 = vmatpush3.bf16.msra.mxu0 %v177_v13 }
  0x11   :  { %179 = vmatprep.subr.bf16.mxu0 %v196_v0 }
  0x14   :  { %181 = vmatpush3.bf16.msra.mxu0 %v180_v16 }
  0x15   :  { %182 = vmatprep.subr.bf16.mxu0 %v196_v0 }
  0x18   :  { %184 = vmatpush3.bf16.msra.mxu0 %v183_v19 }
  0x19   :  { %185 = vmatprep.subr.bf16.mxu0 %v196_v0 }
  0x1c   :  { %187 = vmatpush3.bf16.msra.mxu0 %v186_v22 }
  0x1d   :  { %188 = vmatprep.subr.bf16.mxu0 %v196_v0 }
  0x20   :  { %190 = vmatpush3.bf16.msra.mxu0 %v189_v25 }
  0x23   :  { %165 = vmatmul.mubr.f32.vlgmr.msra.gmra.mrb[0].mxu0 %v14_v26 }
  0xf6   :  { %v104_v28 = vpop.f32.mrb[0].mxu0 }
  0xf7   :  { %v105_v29 = vadd.f32 %v114_v27, %v104_v28  ;;  %v166_v30 = vpop.f32.mrb[1].mxu0 }
  0xf9   :  { %194 = vtanh.f32 %v105_v29 }
 0x103   :  { %v195_v31 = vpop.eup %194 }
 0x104   :  { %109 = vst [vmem:[%s279_s3] sm:$0xff] %v195_v31 }

</bundles_post_ra>
